<compile_context>
chip_gen: v6e
topology: v6e:2x2x1
jax: 0.10.0
libtpu: 0.0.40
codegen_flags: <defaults>
</compile_context>

<pallas_src>
import functools

import jax
import jax.numpy as jnp
from jax import lax
from jax.experimental import pallas as pl
from jax.experimental.pallas import tpu as pltpu

NEG = -1.0e12  # ark_nlp uses -1e12 for '-inf'


def _global_pointer_logits_kernel(q_ref, k_ref, mrow_ref, mcol_ref, o_ref,
                                  *, gh, tq, inv_scale):
    # q_ref    : (1, GH, TQ, D) bf16  -- rows pre-masked and pre-scaled by 1/sqrt(D)
    # k_ref    : (1, GH, S,  D) bf16  -- rows pre-masked
    # mrow_ref : (1, TQ, 1)     f32   -- sequence mask, query rows of this tile
    # mcol_ref : (1, 1, S)      f32   -- sequence mask, key columns
    # o_ref    : (1, GH, TQ, S)
    S = k_ref.shape[2]
    qt = pl.program_id(2)

    # Additive mask shared by every head of the group (computed once per step):
    #   masked seq positions -> -1e12/sqrt(D);   strict lower triangle -> extra -1e12/sqrt(D)
    mrow = mrow_ref[0]                                               # (TQ, 1)
    mcol = mcol_ref[0]                                               # (1, S)
    row_ids = lax.broadcasted_iota(jnp.int32, (tq, S), 0) + qt * tq
    col_ids = lax.broadcasted_iota(jnp.int32, (tq, S), 1)
    tril = (row_ids > col_ids).astype(jnp.float32)
    madd = (NEG * inv_scale) * ((1.0 - mrow * mcol) + tril)          # (TQ, S) f32

    contract = (((1,), (1,)), ((), ()))                              # q @ k^T
    for h in range(gh):                                              # GH capped at 4
        logits = lax.dot_general(q_ref[0, h], k_ref[0, h], contract,
                                 preferred_element_type=jnp.float32)  # (TQ, S)
        # one add + one cast per element
        o_ref[0, h] = (logits + madd).astype(o_ref.dtype)


def _choose_tiles(heads, S, out_itemsize):
    """Pick (head-group size, query tile) so the output block stays <= ~4 MiB."""
    if S <= 256:
        tq = S
    else:
        tq = next((t for t in (256, 128, 64, 32, 16, 8) if S % t == 0), S)

    gh = 1
    for cand in (4, 2, 1):                 # cap GH at 4 (bounded unroll / live ranges)
        if heads % cand == 0:
            gh = cand
            break

    budget = 4 * 1024 * 1024
    while gh > 1 and gh * tq * S * out_itemsize > budget:
        gh //= 2
    while (tq > 8 and gh * tq * S * out_itemsize > budget
           and tq % 2 == 0 and (tq // 2) % 8 == 0 and S % (tq // 2) == 0):
        tq //= 2
    return gh, tq


def _vmem_limit_bytes():
    """Generation-aware VMEM limit: ~48 MiB on v7x (64 MiB/TC), up to 96 MiB on v5e/v6e."""
    try:
        cap = int(pltpu.get_tpu_info().vmem_capacity_bytes)
    except Exception:
        cap = 64 * 1024 * 1024
    return min((cap * 3) // 4, 96 * 1024 * 1024)


def global_pointer_forward(x, W, b, mask, *, heads, head_size,
                           rope=True, out_dtype=jnp.bfloat16):
    """GlobalPointer forward.  NOTE: default out_dtype=bfloat16 rounds the -1e12
    sentinels by ~0.4% (fine for thresholding/argmax); use float32 for exactness."""
    B, S, HID = x.shape
    D = head_size
    OUT = 2 * heads * D
    assert W.shape == (HID, OUT) and b.shape == (OUT,)
    assert D % 2 == 0

    inv_scale = 1.0 / float(D) ** 0.5
    maskf = mask.astype(jnp.float32)

    # ---- hoisted: dense projection (nn.Linear) ----
    proj = jnp.dot(x.astype(jnp.bfloat16), W.astype(jnp.bfloat16),
                   preferred_element_type=jnp.float32) + b.astype(jnp.float32)
    proj = proj.reshape(B, S, heads, 2 * D)
    qw, kw = proj[..., :D], proj[..., D:]

    # ---- hoisted: RoPE (ark_nlp SinusoidalPositionEmbedding 'zero' semantics) ----
    if rope:
        pos_ids = jnp.arange(S, dtype=jnp.float32)
        idx = jnp.arange(D // 2, dtype=jnp.float32)
        theta = jnp.power(10000.0, -2.0 * idx / D)
        ang = pos_ids[:, None] * theta[None, :]                        # (S, D/2)
        # torch .repeat(..., 2) TILES (not interleaves) the half-width tables:
        cos_pos = jnp.tile(jnp.cos(ang), (1, 2))[None, :, None, :]     # (1, S, 1, D)
        sin_pos = jnp.tile(jnp.sin(ang), (1, 2))[None, :, None, :]
        qw2 = jnp.stack([-qw[..., 1::2], qw[..., ::2]], axis=-1).reshape(qw.shape)
        kw2 = jnp.stack([-kw[..., 1::2], kw[..., ::2]], axis=-1).reshape(kw.shape)
        qw = qw * cos_pos + qw2 * sin_pos
        kw = kw * cos_pos + kw2 * sin_pos

    # ---- fold sequence mask + 1/sqrt(D) into the bf16 q/k rows ----
    mrows = maskf[:, :, None, None]                                    # (B, S, 1, 1)
    q_bh = jnp.transpose(qw * (mrows * inv_scale), (0, 2, 1, 3)).astype(jnp.bfloat16)
    k_bh = jnp.transpose(kw * mrows, (0, 2, 1, 3)).astype(jnp.bfloat16)  # (B, H, S, D)

    GH, TQ = _choose_tiles(heads, S, jnp.dtype(out_dtype).itemsize)
    n_hg = heads // GH
    n_qt = S // TQ

    mask_row = maskf[:, :, None]                                       # (B, S, 1)
    mask_col = maskf[:, None, :]                                       # (B, 1, S)

    kernel = functools.partial(_global_pointer_logits_kernel,
                               gh=GH, tq=TQ, inv_scale=inv_scale)

    grid_spec = pltpu.PrefetchScalarGridSpec(
        num_scalar_prefetch=0,
        grid=(B, n_hg, n_qt),
        in_specs=[
            pl.BlockSpec((1, GH, TQ, D), lambda bb, g, qt: (bb, g, qt, 0)),   # q tile
            pl.BlockSpec((1, GH, S, D), lambda bb, g, qt: (bb, g, 0, 0)),     # k (full seq)
            pl.BlockSpec((1, TQ, 1), lambda bb, g, qt: (bb, qt, 0)),          # mask rows
            pl.BlockSpec((1, 1, S), lambda bb, g, qt: (bb, 0, 0)),            # mask cols
        ],
        out_specs=pl.BlockSpec((1, GH, TQ, S),
                               lambda bb, g, qt: (bb, g, qt, 0)),
    )

    fn = pl.pallas_call(
        kernel,
        out_shape=jax.ShapeDtypeStruct((B, heads, S, S), out_dtype),
        grid_spec=grid_spec,
        compiler_params=pltpu.CompilerParams(
            # all axes are independent -> both v7x TensorCores usable even for B=1
            dimension_semantics=("parallel", "parallel", "parallel"),
            vmem_limit_bytes=_vmem_limit_bytes()),
    )
    return fn(q_bh, k_bh, mask_row, mask_col)


def global_pointer_reference(x, W, b, mask, *, heads, head_size):
    """Pure-JAX (f32) re-implementation of the PyTorch forward, for validation."""
    B, S, HID = x.shape
    D = head_size
    proj = x @ W + b                                                   # (B, S, 2*H*D)
    proj = proj.reshape(B, S, heads, 2 * D)
    qw, kw = proj[..., :D], proj[..., D:]

    pos_ids = jnp.arange(S, dtype=jnp.float32)
    idx = jnp.arange(D // 2, dtype=jnp.float32)
    theta = jnp.power(10000.0, -2.0 * idx / D)
    ang = pos_ids[:, None] * theta[None, :]
    pos = jnp.stack([jnp.sin(ang), jnp.cos(ang)], axis=-1).reshape(S, D)
    cos_pos = jnp.tile(pos[None, :, None, 1::2], (1, 1, 1, 2))
    sin_pos = jnp.tile(pos[None, :, None, 0::2], (1, 1, 1, 2))

    qw2 = jnp.stack([-qw[..., 1::2], qw[..., ::2]], axis=4).reshape(qw.shape)
    qwr = qw * cos_pos + qw2 * sin_pos
    kw2 = jnp.stack([-kw[..., 1::2], kw[..., ::2]], axis=4).reshape(kw.shape)
    kwr = kw * cos_pos + kw2 * sin_pos

    logits = jnp.einsum('bmhd,bnhd->bhmn', qwr, kwr)
    m = mask.astype(logits.dtype)
    mr = m[:, None, :, None]
    mc = m[:, None, None, :]
    logits = logits * mr + NEG * (1 - mr)
    logits = logits * mc + NEG * (1 - mc)
    tril = jnp.tril(jnp.ones((S, S), logits.dtype), k=-1)
    logits = logits - tril * 1.0e12
    return logits / (D ** 0.5)


if __name__ == "__main__":
    def _run_case(case_id, B, S, HID, HEADS, D, seq_lens):
        key = jax.random.fold_in(jax.random.PRNGKey(0), case_id)
        kx, kw, kb = jax.random.split(key, 3)
        x = jax.random.normal(kx, (B, S, HID), dtype=jnp.float32)
        W = jax.random.normal(kw, (HID, 2 * HEADS * D), dtype=jnp.float32) * 0.05
        b = jax.random.normal(kb, (2 * HEADS * D,), dtype=jnp.float32) * 0.05
        lengths = jnp.asarray(seq_lens)
        mask = (jnp.arange(S)[None, :] < lengths[:, None]).astype(jnp.float32)

        out = global_pointer_forward(x, W, b, mask, heads=HEADS, head_size=D)
        out = jax.block_until_ready(out)
        ref = global_pointer_reference(x, W, b, mask, heads=HEADS, head_size=D)
        ref = jax.block_until_ready(ref)

        assert out.shape == (B, HEADS, S, S)
        # bf16 matmuls + bf16 output (f32 accumulation) -> loose tolerance vs f32 ref.
        out32 = out.astype(jnp.float32)
        if not jnp.allclose(out32, ref, rtol=2.5e-2, atol=1.25e-1):
            err = float(jnp.max(jnp.abs(out32 - ref)))
            raise AssertionError(
                f"case {case_id}: Pallas output mismatch (max abs err={err:.4g})")

    # Small shape consistent with the module (single head-group, single q-tile).
    _run_case(0, B=2, S=8, HID=32, HEADS=4, D=16, seq_lens=[8, 5])
    # Tiled path: 2 head-groups of 4 heads, 3 query tiles of 128.
    _run_case(1, B=1, S=384, HID=128, HEADS=8, D=64, seq_lens=[300])

    print("KERNEL_OK")
</pallas_src>

<mosaic_0001>
module attributes {stable_mosaic.version = 11 : i64} {
  func.func @_global_pointer_logits_kernel(%arg0: i32, %arg1: i32, %arg2: i32, %arg3: memref<1x4x8x16xbf16, #tpu.memory_space<vmem>>, %arg4: memref<1x4x8x16xbf16, #tpu.memory_space<vmem>>, %arg5: memref<1x8x1xf32, #tpu.memory_space<vmem>>, %arg6: memref<1x1x8xf32, #tpu.memory_space<vmem>>, %arg7: memref<1x4x8x8xbf16, #tpu.memory_space<vmem>>) attributes {dimension_semantics = [#tpu.dimension_semantics<parallel>, #tpu.dimension_semantics<parallel>, #tpu.dimension_semantics<parallel>], iteration_bounds = array<i64: 2, 1, 1>, scalar_prefetch = 0 : i64, scratch_operands = 0 : i64, tpu.core_type = #tpu.core_type<tc>, window_params = [{transform_indices = @transform_0, window_bounds = array<i64: 1, 4, 8, 16>}, {transform_indices = @transform_1, window_bounds = array<i64: 1, 4, 8, 16>}, {transform_indices = @transform_2, window_bounds = array<i64: 1, 8, 1>}, {transform_indices = @transform_3, window_bounds = array<i64: 1, 1, 8>}, {transform_indices = @transform_4, window_bounds = array<i64: 1, 4, 8, 8>}]} {
    %c0 = arith.constant 0 : index
    %c0_0 = arith.constant 0 : index
    %c0_1 = arith.constant 0 : index
    %0 = vector.load %arg5[%c0, %c0_0, %c0_1] : memref<1x8x1xf32, #tpu.memory_space<vmem>>, vector<1x8x1xf32>
    %1 = vector.shape_cast %0 : vector<1x8x1xf32> to vector<8x1xf32>
    %c0_2 = arith.constant 0 : index
    %c0_3 = arith.constant 0 : index
    %c0_4 = arith.constant 0 : index
    %2 = vector.load %arg6[%c0_2, %c0_3, %c0_4] : memref<1x1x8xf32, #tpu.memory_space<vmem>>, vector<1x1x8xf32>
    %3 = vector.shape_cast %2 : vector<1x1x8xf32> to vector<1x8xf32>
    %4 = tpu.iota {dimensions = array<i32: 0>} : vector<8x8xi32>
    %c8_i32 = arith.constant 8 : i32
    %5 = arith.muli %arg2, %c8_i32 : i32
    %6 = vector.broadcast %5 : i32 to vector<8x8xi32>
    %7 = arith.addi %4, %6 : vector<8x8xi32>
    %8 = tpu.iota {dimensions = array<i32: 1>} : vector<8x8xi32>
    %9 = arith.cmpi sgt, %7, %8 : vector<8x8xi32>
    %10 = arith.extui %9 : vector<8x8xi1> to vector<8x8xi32>
    %11 = arith.sitofp %10 : vector<8x8xi32> to vector<8x8xf32>
    %12 = vector.broadcast %1 : vector<8x1xf32> to vector<8x8xf32>
    %13 = vector.broadcast %3 : vector<1x8xf32> to vector<8x8xf32>
    %14 = arith.mulf %12, %13 : vector<8x8xf32>
    %cst = arith.constant 1.000000e+00 : f32
    %15 = vector.broadcast %cst : f32 to vector<8x8xf32>
    %16 = arith.subf %15, %14 : vector<8x8xf32>
    %17 = arith.addf %16, %11 : vector<8x8xf32>
    %cst_5 = arith.constant -2.500000e+11 : f32
    %18 = vector.broadcast %cst_5 : f32 to vector<8x8xf32>
    %19 = arith.mulf %18, %17 : vector<8x8xf32>
    %c0_6 = arith.constant 0 : index
    %c0_7 = arith.constant 0 : index
    %c0_8 = arith.constant 0 : index
    %c0_9 = arith.constant 0 : index
    %20 = vector.load %arg3[%c0_6, %c0_7, %c0_8, %c0_9] : memref<1x4x8x16xbf16, #tpu.memory_space<vmem>>, vector<1x1x8x16xbf16>
    %21 = vector.shape_cast %20 : vector<1x1x8x16xbf16> to vector<8x16xbf16>
    %c0_10 = arith.constant 0 : index
    %c0_11 = arith.constant 0 : index
    %c0_12 = arith.constant 0 : index
    %c0_13 = arith.constant 0 : index
    %22 = vector.load %arg4[%c0_10, %c0_11, %c0_12, %c0_13] : memref<1x4x8x16xbf16, #tpu.memory_space<vmem>>, vector<1x1x8x16xbf16>
    %23 = vector.shape_cast %22 : vector<1x1x8x16xbf16> to vector<8x16xbf16>
    %cst_14 = arith.constant dense<0.000000e+00> : vector<8x8xf32>
    %24 = tpu.matmul %21, %23, %cst_14 {dimension_numbers = #tpu.dot_dimension_numbers<[1], [1], [0], [0], [0, 0, 1, 0], [], []>} : vector<8x16xbf16>, vector<8x16xbf16>, vector<8x8xf32> -> vector<8x8xf32>
    %25 = arith.addf %24, %19 : vector<8x8xf32>
    %26 = arith.truncf %25 : vector<8x8xf32> to vector<8x8xbf16>
    %c0_15 = arith.constant 0 : index
    %c0_16 = arith.constant 0 : index
    %c0_17 = arith.constant 0 : index
    %c0_18 = arith.constant 0 : index
    %27 = vector.load %arg7[%c0_15, %c0_16, %c0_17, %c0_18] : memref<1x4x8x8xbf16, #tpu.memory_space<vmem>>, vector<1x1x8x8xbf16>
    %28 = vector.shape_cast %27 : vector<1x1x8x8xbf16> to vector<8x8xbf16>
    %29 = vector.shape_cast %26 : vector<8x8xbf16> to vector<1x1x8x8xbf16>
    tpu.vector_store %arg7[%c0_15, %c0_16, %c0_17, %c0_18], %29 {strides = array<i32>} : memref<1x4x8x8xbf16, #tpu.memory_space<vmem>>, vector<1x1x8x8xbf16>,
    %c0_19 = arith.constant 0 : index
    %c1 = arith.constant 1 : index
    %c0_20 = arith.constant 0 : index
    %c0_21 = arith.constant 0 : index
    %30 = vector.load %arg3[%c0_19, %c1, %c0_20, %c0_21] : memref<1x4x8x16xbf16, #tpu.memory_space<vmem>>, vector<1x1x8x16xbf16>
    %31 = vector.shape_cast %30 : vector<1x1x8x16xbf16> to vector<8x16xbf16>
    %c0_22 = arith.constant 0 : index
    %c1_23 = arith.constant 1 : index
    %c0_24 = arith.constant 0 : index
    %c0_25 = arith.constant 0 : index
    %32 = vector.load %arg4[%c0_22, %c1_23, %c0_24, %c0_25] : memref<1x4x8x16xbf16, #tpu.memory_space<vmem>>, vector<1x1x8x16xbf16>
    %33 = vector.shape_cast %32 : vector<1x1x8x16xbf16> to vector<8x16xbf16>
    %cst_26 = arith.constant dense<0.000000e+00> : vector<8x8xf32>
    %34 = tpu.matmul %31, %33, %cst_26 {dimension_numbers = #tpu.dot_dimension_numbers<[1], [1], [0], [0], [0, 0, 1, 0], [], []>} : vector<8x16xbf16>, vector<8x16xbf16>, vector<8x8xf32> -> vector<8x8xf32>
    %35 = arith.addf %34, %19 : vector<8x8xf32>
    %36 = arith.truncf %35 : vector<8x8xf32> to vector<8x8xbf16>
    %c0_27 = arith.constant 0 : index
    %c1_28 = arith.constant 1 : index
    %c0_29 = arith.constant 0 : index
    %c0_30 = arith.constant 0 : index
    %37 = vector.load %arg7[%c0_27, %c1_28, %c0_29, %c0_30] : memref<1x4x8x8xbf16, #tpu.memory_space<vmem>>, vector<1x1x8x8xbf16>
    %38 = vector.shape_cast %37 : vector<1x1x8x8xbf16> to vector<8x8xbf16>
    %39 = vector.shape_cast %36 : vector<8x8xbf16> to vector<1x1x8x8xbf16>
    tpu.vector_store %arg7[%c0_27, %c1_28, %c0_29, %c0_30], %39 {strides = array<i32>} : memref<1x4x8x8xbf16, #tpu.memory_space<vmem>>, vector<1x1x8x8xbf16>,
    %c0_31 = arith.constant 0 : index
    %c2 = arith.constant 2 : index
    %c0_32 = arith.constant 0 : index
    %c0_33 = arith.constant 0 : index
    %40 = vector.load %arg3[%c0_31, %c2, %c0_32, %c0_33] : memref<1x4x8x16xbf16, #tpu.memory_space<vmem>>, vector<1x1x8x16xbf16>
    %41 = vector.shape_cast %40 : vector<1x1x8x16xbf16> to vector<8x16xbf16>
    %c0_34 = arith.constant 0 : index
    %c2_35 = arith.constant 2 : index
    %c0_36 = arith.constant 0 : index
    %c0_37 = arith.constant 0 : index
    %42 = vector.load %arg4[%c0_34, %c2_35, %c0_36, %c0_37] : memref<1x4x8x16xbf16, #tpu.memory_space<vmem>>, vector<1x1x8x16xbf16>
    %43 = vector.shape_cast %42 : vector<1x1x8x16xbf16> to vector<8x16xbf16>
    %cst_38 = arith.constant dense<0.000000e+00> : vector<8x8xf32>
    %44 = tpu.matmul %41, %43, %cst_38 {dimension_numbers = #tpu.dot_dimension_numbers<[1], [1], [0], [0], [0, 0, 1, 0], [], []>} : vector<8x16xbf16>, vector<8x16xbf16>, vector<8x8xf32> -> vector<8x8xf32>
    %45 = arith.addf %44, %19 : vector<8x8xf32>
    %46 = arith.truncf %45 : vector<8x8xf32> to vector<8x8xbf16>
    %c0_39 = arith.constant 0 : index
    %c2_40 = arith.constant 2 : index
    %c0_41 = arith.constant 0 : index
    %c0_42 = arith.constant 0 : index
    %47 = vector.load %arg7[%c0_39, %c2_40, %c0_41, %c0_42] : memref<1x4x8x8xbf16, #tpu.memory_space<vmem>>, vector<1x1x8x8xbf16>
    %48 = vector.shape_cast %47 : vector<1x1x8x8xbf16> to vector<8x8xbf16>
    %49 = vector.shape_cast %46 : vector<8x8xbf16> to vector<1x1x8x8xbf16>
    tpu.vector_store %arg7[%c0_39, %c2_40, %c0_41, %c0_42], %49 {strides = array<i32>} : memref<1x4x8x8xbf16, #tpu.memory_space<vmem>>, vector<1x1x8x8xbf16>,
    %c0_43 = arith.constant 0 : index
    %c3 = arith.constant 3 : index
    %c0_44 = arith.constant 0 : index
    %c0_45 = arith.constant 0 : index
    %50 = vector.load %arg3[%c0_43, %c3, %c0_44, %c0_45] : memref<1x4x8x16xbf16, #tpu.memory_space<vmem>>, vector<1x1x8x16xbf16>
    %51 = vector.shape_cast %50 : vector<1x1x8x16xbf16> to vector<8x16xbf16>
    %c0_46 = arith.constant 0 : index
    %c3_47 = arith.constant 3 : index
    %c0_48 = arith.constant 0 : index
    %c0_49 = arith.constant 0 : index
    %52 = vector.load %arg4[%c0_46, %c3_47, %c0_48, %c0_49] : memref<1x4x8x16xbf16, #tpu.memory_space<vmem>>, vector<1x1x8x16xbf16>
    %53 = vector.shape_cast %52 : vector<1x1x8x16xbf16> to vector<8x16xbf16>
    %cst_50 = arith.constant dense<0.000000e+00> : vector<8x8xf32>
    %54 = tpu.matmul %51, %53, %cst_50 {dimension_numbers = #tpu.dot_dimension_numbers<[1], [1], [0], [0], [0, 0, 1, 0], [], []>} : vector<8x16xbf16>, vector<8x16xbf16>, vector<8x8xf32> -> vector<8x8xf32>
    %55 = arith.addf %54, %19 : vector<8x8xf32>
    %56 = arith.truncf %55 : vector<8x8xf32> to vector<8x8xbf16>
    %c0_51 = arith.constant 0 : index
    %c3_52 = arith.constant 3 : index
    %c0_53 = arith.constant 0 : index
    %c0_54 = arith.constant 0 : index
    %57 = vector.load %arg7[%c0_51, %c3_52, %c0_53, %c0_54] : memref<1x4x8x8xbf16, #tpu.memory_space<vmem>>, vector<1x1x8x8xbf16>
    %58 = vector.shape_cast %57 : vector<1x1x8x8xbf16> to vector<8x8xbf16>
    %59 = vector.shape_cast %56 : vector<8x8xbf16> to vector<1x1x8x8xbf16>
    tpu.vector_store %arg7[%c0_51, %c3_52, %c0_53, %c0_54], %59 {strides = array<i32>} : memref<1x4x8x8xbf16, #tpu.memory_space<vmem>>, vector<1x1x8x8xbf16>,
    return
  }
  func.func @transform_0(%arg0: i32, %arg1: i32, %arg2: i32) -> (i32, i32, i32, i32) {
    %c0_i32 = arith.constant 0 : i32
    %c0_i32_0 = arith.constant 0 : i32
    return %arg0, %arg1, %arg2, %c0_i32 : i32, i32, i32, i32
  }
  func.func @transform_1(%arg0: i32, %arg1: i32, %arg2: i32) -> (i32, i32, i32, i32) {
    %c0_i32 = arith.constant 0 : i32
    %c0_i32_0 = arith.constant 0 : i32
    %c0_i32_1 = arith.constant 0 : i32
    return %arg0, %arg1, %c0_i32, %c0_i32_0 : i32, i32, i32, i32
  }
  func.func @transform_2(%arg0: i32, %arg1: i32, %arg2: i32) -> (i32, i32, i32) {
    %c0_i32 = arith.constant 0 : i32
    %c0_i32_0 = arith.constant 0 : i32
    return %arg0, %arg2, %c0_i32 : i32, i32, i32
  }
  func.func @transform_3(%arg0: i32, %arg1: i32, %arg2: i32) -> (i32, i32, i32) {
    %c0_i32 = arith.constant 0 : i32
    %c0_i32_0 = arith.constant 0 : i32
    %c0_i32_1 = arith.constant 0 : i32
    return %arg0, %c0_i32, %c0_i32_0 : i32, i32, i32
  }
  func.func @transform_4(%arg0: i32, %arg1: i32, %arg2: i32) -> (i32, i32, i32, i32) {
    %c0_i32 = arith.constant 0 : i32
    %c0_i32_0 = arith.constant 0 : i32
    return %arg0, %arg1, %arg2, %c0_i32 : i32, i32, i32, i32
  }
}

</mosaic_0001>

<bundles_post_ra>
// kernel: tpu_custom_call.1
= control target key start
LH: loop header
LB: loop body
LE: loop exit
PB: predicated region body
PF: predicated region fallthrough
CT: control target
= control target key end

     0   :  { %s1275_s0 = inlined_call_operand.hbm [shape: bf16[2,4,8,16], index: 0, kind: input, shape index: {}]   ;;  %s1276_s1 = inlined_call_operand.hbm [shape: bf16[2,4,8,16], index: 1, kind: input, shape index: {}]   ;;  %s1277_s2 = inlined_call_operand.vmem [shape: f32[2,8,1], index: 2, kind: input, shape index: {}]   ;;  %s1278_s3 = inlined_call_operand.vmem [shape: f32[2,1,8], index: 3, kind: input, shape index: {}]   ;;  %s1279_s4 = inlined_call_operand.hbm [shape: bf16[2,4,8,8], index: 4, kind: output, shape index: {}]  }
   0x1   :  { %1281 = sst [smem:[#allocation12_spill]] %s1275_s0 }
   0x2   :  { %9 = vsyncpa [#allocation3], 0 }
   0x3   :  { %11 = vsyncpa [#allocation3 + $0x1], 0 }
   0x4   :  { %12 = vsyncpa [#allocation6], 0 }
   0x5   :  { %14 = vsyncpa [#allocation6 + $0x1], 0 }
   0x6   :  { %15 = vsyncpa [#allocation4], 0 }
   0x7   :  { %17 = vsyncpa [#allocation4 + $0x1], 0  ;;  %s1055_s15 = smov 0   ;;  %s1057_s16 = smov 0  }
   0x8   :  { %s1059_s17 = smov 0   ;;  %s1061_s18 = smov 0  }
   0x9   :  { %s1063_s19 = smov 0   ;;  %s1065_s20 = smov 0  }
   0xa LB: > { %s733_s21 = sadd.s32 4294967295, %s1018_s20   ;;  %s734_s22 = sadd.s32 4294967294, %s1018_s20   ;;  %s1018_s20 = sphi %s1065_s20, %s23_s20   ;;  %s1014_s19 = sphi %s1063_s19, %s1295_s19   ;;  %s1010_s18 = sphi %s1061_s18, %s1294_s18   ;;  %s1006_s17 = sphi %s1059_s17, %s1293_s17   ;;  %s1002_s16 = sphi %s1057_s16, %s1292_s16   ;;  %s998_s15 = sphi %s1055_s15, %s1291_s15  }
   0xb   : > { %s42_s23 = sadd.s32 1, %s1014_s19  ;;  %s53_s24 = sadd.s32 1, %s1006_s17 }
   0xc   : > { %p44_p0 = scmp.ge.s32.totalorder %s42_s23, 2  ;;  %p60_p1 = scmp.ne.s32.totalorder %s1006_s17, %s1002_s16 }
   0xd   : > { %p61_p2 = scmp.eq.s32.totalorder %s1018_s20, 0  ;;  %p66_p3 = scmp.ne.s32.totalorder %s1002_s16, %s998_s15 }
   0xe   : > { %s1297_s23 = smov (%p44_p0, %s42_s23), 0  ;;  %p67_p5 = scmp.eq.s32.totalorder %s733_s21, 0 }
   0xf   : > { %1282 = sst [smem:[#allocation11_spill]] %s1297_s23  ;;  %p1096_p4 = por %p61_p2, %p60_p1 }
  0x10   : > { %s46_s26 = ssub.s32 %s1014_s19, %s1297_s23  ;;  %p176_p6 = scmp.eq.s32.totalorder %s733_s21, 1 }
  0x11   : > { %p51_p7 = scmp.eq.s32.totalorder %s46_s26, 0  ;;  %p1102_p8 = por %p67_p5, %p66_p3 }
  0x12   : > { %p1106_p9 = por %p176_p6, %p60_p1  ;;  %p182_p10 = scmp.eq.s32.totalorder %s734_s22, 1 }
  0x13   : > { %s1111_s29 = scalar_select %p51_p7, %s1006_s17, %s53_s24  }
  0x14   : > { %p1113_p11 = por %p182_p10, %p66_p3  ;;  %p736_p12 = scmp.ge.s32.totalorder %s1018_s20, 2 }
  0x15   : > { %p820_p13 = scmp.lt.s32.totalorder %s1018_s20, 2  ;;  %s1120_s5 = sand.u32 1, %s1006_s17  }
  0x16   : > { %s737_s6 = sshll.u32 %s1120_s5, 4  ;;  %s768_s7 = sshll.u32 %s1014_s19, 8 }
  0x17   : > { %s1287_s0 = sld [smem:[#allocation12_spill]]  ;;  %s206_s11 = scalar_lea.vmem [#allocation2], %s737_s6 }
  0x18   : > { %s216_s12 = sshll.u32 %s206_s11, 4  ;;  %p1133_p0 = pnand %p820_p13, %p1096_p4  ;;  %s217_s12 = int_to_ptr.vmem [resolvable:$true] %s216_s12 }
  0x19   : > { %p743_p1 = scmp.ge.s32.totalorder %s1018_s20, 1  ;;  %s203_s14 = scalar_lea.sflag [#allocation3], %s1120_s5 }
  0x1a   : > { %p880_p2 = pneg %p1133_p0  ;;  %s891_s21 = scalar_lea.vmem %s217_s12, 256 }
  0x1b   : > { %p892_p3 = scmp.ne.s32.totalorder %s217_s12, %s891_s21  ;;  %s1020_s22 = smov [#allocation2]  }
  0x1c   : > { %s896_s24 = sshll.u32 %s1020_s22, 4  ;;  %s897_s24 = int_to_ptr.vmem [resolvable:$false] %s896_s24 }
  0x1d   : > { %s215_s10 = scalar_lea.hbm %s1287_s0, %s768_s7  ;;  %p894_p5 = pnand %p892_p3, %p880_p2 }
  0x1e   : > { %s898_s25 = scalar_lea.vmem %s897_s24, 512  ;;  %p899_p4 = scmp.lt.s32.totalorder %s217_s12, %s897_s24 }
  0x1f   : > { %p895_p6 = pneg %p894_p5  ;;  %p900_p7 = scmp.lt.s32.totalorder %s898_s25, %s891_s21 }
  0x21   : > { %p901_p10 = por %p900_p7, %p899_p4 }
  0x23   : > { %p902_p13 = pnand %p901_p10, %p895_p6 }
  0x25   : > { %905 = shalt.err (!%p902_p13)
}
  0x26   : > { %s1021_s26 = smov 64   ;;  %s1022_s8 = smov 4  }
  0x27   : > { %812 = dma.hbm_to_vmem [thread:$0]  (!%p1133_p0), %s215_s10, 256, %s217_s12, %s203_s14, %s1021_s26, %s1021_s26, %s1022_s8  }
  0x28   : > { %p263_p3 = scmp.lt.s32.totalorder %s1018_s20, 3  ;;  %s238_s21 = scalar_lea.hbm %s1276_s1, %s768_s7 }
  0x29   : > { %s230_s24 = scalar_lea.vmem [#allocation5], %s737_s6  ;;  %s227_s0 = scalar_lea.sflag [#allocation6], %s1120_s5 }
  0x2a   : > { %p1154_p5 = pnand %p743_p1, %p263_p3  ;;  %s239_s25 = sshll.u32 %s230_s24, 4  ;;  %s240_s25 = int_to_ptr.vmem [resolvable:$true] %s239_s25 }
  0x2b   : > { %s919_s23 = scalar_lea.vmem %s240_s25, 256  ;;  %s1023_s10 = smov [#allocation5]  }
  0x2c   : > { %p920_p6 = scmp.ne.s32.totalorder %s240_s25, %s919_s23  ;;  %s924_s12 = sshll.u32 %s1023_s10, 4  ;;  %s925_s12 = int_to_ptr.vmem [resolvable:$false] %s924_s12 }
  0x2d   : > { %s926_s7 = scalar_lea.vmem %s925_s12, 512  ;;  %p927_p10 = scmp.lt.s32.totalorder %s240_s25, %s925_s12 }
  0x2e   : > { %p922_p4 = pnand %p920_p6, %p880_p2  ;;  %p928_p1 = scmp.lt.s32.totalorder %s926_s7, %s919_s23 }
  0x30   : > { %p923_p7 = pneg %p922_p4  ;;  %p929_p13 = por %p928_p1, %p927_p10 }
  0x32   : > { %p930_p3 = pnand %p929_p13, %p923_p7 }
  0x34   : > { %933 = shalt.err (!%p930_p3)
}
  0x35   : > { %815 = dma.hbm_to_vmem [thread:$0]  (!%p1133_p0), %s238_s21, 256, %s240_s25, %s227_s0, %s1021_s26, %s1021_s26, %s1022_s8  }
  0x36   : > { %267 = sbr.rel (%p1154_p5) target bundleno = 293 (0x125), region = 36  ;;  %s1169_s5 = sand.u32 (!%p1154_p5), 1, %s1002_s16  }
  0x37   : > { %s1172_s6 = sshll.u32 (!%p1154_p5), %s1169_s5, 4  ;;  %s270_s14 = scalar_lea.sflag (!%p1154_p5), [#allocation3], %s1169_s5 }
  0x38   : > { %s1176_s23 = scalar_lea.vmem (!%p1154_p5), [#allocation2], %s1172_s6 }
  0x3b   : > { %985 = dma.done.wait (%p1102_p8), %s270_s14, 256  }
  0x3c   : > { %987 = vsyncadd (%p1102_p8), %s270_s14, 4294967040  ;;  %s279_s0 = scalar_lea.sflag [#allocation6], %s1169_s5  ;;  %s282_s13 = scalar_lea.vmem [#allocation5], %s1172_s6 }
  0x3d   : > { %989 = dma.done.wait (%p1102_p8), %s279_s0, 256  }
  0x3e   : > { %991 = vsyncadd (%p1102_p8), %s279_s0, 4294967040  ;;  %p324_p0 = scmp.lt.s32.totalorder %s1010_s18, 1  ;;  %v1024_v0 = vmov 0.0   ;;  %vm1025_vm0 = vmmov 0   ;;  %v1026_v1 = vmov 0   ;;  %vm365_vm1 = vcmask 130048  }
  0x3f   : > { %779 = vmatprep.subr.bf16.mxu0 %v1024_v0  ;;  %785 = vmatprep.subr.bf16.mxu1 %v1024_v0  ;;  %v364_v2 = vld [vmem:[%s282_s13] sm:$0xf]  ;;  %v752_v3 = vld [vmem:[%s282_s13 + $0x4] sm:$0xf]  ;;  %v756_v7 = vld [vmem:[%s282_s13 + $0x8] sm:$0xf]  ;;  %v338_v15 = vlaneseq }
  0x40   : > { %781 = vmatprep.mubr.msk.bf16.mxu0 %vm1025_vm0, %v1024_v0  ;;  %787 = vmatprep.mubr.msk.bf16.mxu1 %vm1025_vm0, %v1024_v0  ;;  %s1192_s26 = scalar_select %p324_p0, %s1010_s18, 1  ;;  %v370_v4 = vsel %vm365_vm1, %v364_v2, 0  ;;  %v423_v5 = vsel %vm365_vm1, %v752_v3, 0  ;;  %v760_v8 = vld [vmem:[%s282_s13 + $0xc] sm:$0xf]  ;;  %v476_v11 = vsel %vm365_vm1, %v756_v7, 0 }
  0x41   : > { %877 = vset.pattern.permute.xlu0 %v1026_v1  ;;  %780 = vmatpush3.bf16.xpose.msra.mxu0 %v370_v4  ;;  %v363_v9 = vld [vmem:[%s1176_s23] sm:$0xf]  ;;  %v751_v10 = vld [vmem:[%s1176_s23 + $0x4] sm:$0xf]  ;;  %v529_v12 = vsel %vm365_vm1, %v760_v8, 0  ;;  %v339_v16 = vshrl.u32 %v338_v15, 7 }
  0x42   : > { %s747_s8 = sshll.u32 %s1192_s26, 3  ;;  %786 = vmatpush3.bf16.xpose.msra.mxu1 %v423_v5  ;;  %791 = vmatprep.subr.bf16.mxu0 %v1024_v0  ;;  %v755_v13 = vld [vmem:[%s1176_s23 + $0x8] sm:$0xf]  ;;  %v759_v14 = vld [vmem:[%s1176_s23 + $0xc] sm:$0xf]  ;;  %s333_s24 = scalar_lea.vmem %s1278_s3, %s1192_s26  ;;  %v344_v17 = vand.u32 127, %v338_v15 }
  0x43   : > { %s330_s11 = scalar_lea.vmem %s1277_s2, %s747_s8  ;;  %797 = vmatprep.subr.bf16.mxu1 %v1024_v0  ;;  %v749_v18 = vld [vmem:[%s333_s24] ss:$0 sm:$0xff]  ;;  %vm413_vm3 = vcmask 60416   ;;  %s321_s25 = scalar_lea.vmem [#allocation7], %s1172_s6 }
  0x44   : > { %v336_v6 = vld [vmem:[%s330_s11] sm:$0xff]  ;;  %vm345_vm2 = vcmp.gt.s32.totalorder %v339_v16, %v344_v17  ;;  %s591_s10 = sshll.u32 %s321_s25, 4  ;;  %s770_s12 = sshll.u32 %s1010_s18, 8  ;;  %s1220_s10 = int_to_ptr.vmem [resolvable:$true] %s591_s10 }
  0x45   : > { %350 = vperm.xlu0 %877, %v336_v6   ;;  %v748_v21 = vsel %vm345_vm2, 1.0, %v1024_v0  ;;  %s1225_s14 = scalar_lea.hbm %s1279_s4, %s770_s12  ;;  %s575_s18 = scalar_lea.sflag [#allocation4], %s1169_s5 }
  0x46   : > { %s934_s23 = scalar_lea.vmem %s1220_s10, 256  ;;  %s1027_s0 = smov [#allocation7]  }
  0x47   : > { %p935_p8 = scmp.ne.s32.totalorder %s1220_s10, %s934_s23  ;;  %s938_s13 = sshll.u32 %s1027_s0, 4  ;;  %s939_s13 = int_to_ptr.vmem [resolvable:$false] %s938_s13 }
  0x48   : > { %782 = vmatmul.mubr.msk.bf16.vlgmr.msra.gmra.mxu0 %vm365_vm1, %v363_v9  ;;  %s940_s26 = scalar_lea.vmem %s939_s13, 512  ;;  %p941_p6 = scmp.lt.s32.totalorder %s1220_s10, %s939_s13 }
  0x49   : > { %788 = vmatmul.mubr.msk.bf16.vlgmr.msra.gmra.mxu1 %vm365_vm1, %v751_v10  ;;  %792 = vmatpush3.bf16.xpose.msra.mxu0 %v476_v11  ;;  %p936_p2 = pnand %p935_p8, %p1106_p9  ;;  %p942_p4 = scmp.lt.s32.totalorder %s940_s26, %s934_s23 }
  0x4a   : > { %798 = vmatpush3.bf16.xpose.msra.mxu1 %v529_v12  ;;  %793 = vmatprep.mubr.msk.bf16.mxu0 %vm1025_vm0, %v1024_v0 }
  0x4b   : > { %799 = vmatprep.mubr.msk.bf16.mxu1 %vm1025_vm0, %v1024_v0  ;;  %p937_p5 = pneg %p936_p2  ;;  %p943_p7 = por %p942_p4, %p941_p6 }
  0x4d   : > { %p944_p10 = pnand %p943_p7, %p937_p5 }
  0x50   : > { %794 = vmatmul.mubr.msk.bf16.vlgmr.msra.gmra.mxu0 %vm365_vm1, %v755_v13 }
  0x51   : > { %800 = vmatmul.mubr.msk.bf16.vlgmr.msra.gmra.mxu1 %vm365_vm1, %v759_v14 }
  0xc0   : > { %v351_v19 = vpop.permute.xlu0 %350 }
  0xc1   : > { %v359_v20 = vmul.f32 %v749_v18, %v351_v19 }
  0xc3   : > { %v360_v22 = vsub.f32 1.0, %v359_v20 }
  0xc5   : > { %v361_v23 = vadd.f32 %v748_v21, %v360_v22 }
  0xc7   : > { %v362_v24 = vmul.f32 -2.5e+11, %v361_v23 }
 0x108   : > { %v406_v25 = vpop.f32.mrf.mxu0 }
 0x109   : > { %v459_v26 = vpop.f32.mrf.mxu1  ;;  %v407_v27 = vadd.f32 %v406_v25, %v362_v24 }
 0x10a   : > { %v460_v28 = vadd.f32 %v459_v26, %v362_v24  ;;  %v783_v29 = vpop.f32.mrf.mxu0 }
 0x10b   : > { %v789_v30 = vpop.f32.mrf.mxu1  ;;  %v412_v31 = vpack.c.bf16 %v407_v27, %v407_v27 }
 0x10c   : > { %v465_v32 = vpack.c.bf16 %v460_v28, %v460_v28  ;;  %v409_v33 = vpop.f32.mrf.mxu0 }
 0x10d   : > { %v462_v34 = vpop.f32.mrf.mxu1  ;;  %414 = vst.msk [vmem:[%s321_s25] sm:$0xf] %vm413_vm3, %v412_v31 }
 0x10e   : > { %754 = vst.msk [vmem:[%s321_s25 + $0x4] sm:$0xf] %vm413_vm3, %v465_v32  ;;  %v784_v35 = vpop.f32.mrf.mxu0 }
 0x10f   : > { %v790_v36 = vpop.f32.mrf.mxu1 }
 0x110   : > { %v512_v37 = vpop.f32.mrf.mxu0 }
 0x111   : > { %v565_v38 = vpop.f32.mrf.mxu1  ;;  %v513_v39 = vadd.f32 %v512_v37, %v362_v24 }
 0x112   : > { %v566_v40 = vadd.f32 %v565_v38, %v362_v24  ;;  %v795_v41 = vpop.f32.mrf.mxu0 }
 0x113   : > { %v801_v42 = vpop.f32.mrf.mxu1  ;;  %v518_v43 = vpack.c.bf16 %v513_v39, %v513_v39 }
 0x114   : > { %v571_v44 = vpack.c.bf16 %v566_v40, %v566_v40  ;;  %v515_v45 = vpop.f32.mrf.mxu0 }
 0x115   : > { %v568_v46 = vpop.f32.mrf.mxu1  ;;  %758 = vst.msk [vmem:[%s321_s25 + $0x8] sm:$0xf] %vm413_vm3, %v518_v43 }
 0x116   : > { %762 = vst.msk [vmem:[%s321_s25 + $0xc] sm:$0xf] %vm413_vm3, %v571_v44  ;;  %v796_v47 = vpop.f32.mrf.mxu0 }
 0x117   : > { %v802_v48 = vpop.f32.mrf.mxu1 }
 0x118   : > { %947 = shalt.err (!%p944_p10)
}
 0x119   : > { %s948_s8 = scalar_lea.hbm %s1225_s14, 256  ;;  %s952_s11 = scalar_lea.hbm %s1279_s4, 512 }
 0x11a   : > { %p949_p1 = scmp.ne.s32.totalorder %s1225_s14, %s948_s8  ;;  %p953_p0 = scmp.lt.s32.totalorder %s1225_s14, %s1279_s4 }
 0x11b   : > { %p954_p8 = scmp.lt.s32.totalorder %s952_s11, %s948_s8 }
 0x11c   : > { %p950_p13 = pnand %p949_p1, %p1106_p9 }
 0x11d   : > { %p955_p2 = por %p954_p8, %p953_p0 }
 0x11e   : > { %p951_p3 = pneg %p950_p13 }
 0x120   : > { %p956_p5 = pnand %p955_p2, %p951_p3 }
 0x122   : > { %959 = shalt.err (!%p956_p5)
}
 0x123   : > { %s1028_s24 = smov 64   ;;  %s1029_s25 = smov 4  }
 0x124   : > { %807 = dma.vmem_to_hbm [thread:$0]  (%p1106_p9), %s1220_s10, 256, %s1225_s14, %s575_s18, %s1028_s24, %s1028_s24, %s1029_s25  }
 0x125 PF: > { %s606_s12 = sand.u32 1, %s998_s15   ;;  %p817_p6 = pnand %p736_p12, %p1113_p11 }
 0x126   : > { %s607_s7 = scalar_lea.sflag [#allocation4], %s606_s12 }
 0x127   : > { %p818_p4 = pneg %p817_p6 }
 0x129   : > { %993 = dma.done.wait (%p818_p4), %s607_s7, 256  }
 0x12a   : > { %995 = vsyncadd (%p818_p4), %s607_s7, 4294967040  ;;  %s23_s20 = sadd.s32 1, %s1018_s20   ;;  %s1290_s28 = sld [smem:[#allocation11_spill]] }
 0x12b   : > { %p20_p7 = scmp.ge.s32.totalorder %s23_s20, 4   ;;  %s1291_s15 = smov %s1002_s16 }
 0x12c   : > { %s1292_s16 = smov %s1006_s17  ;;  %s1293_s17 = smov %s1111_s29 }
 0x12d   : > { %s1294_s18 = smov %s1014_s19  ;;  %22 = sbr.rel (!%p20_p7) target bundleno = 10 (0xa), region = 109 }
 0x130   : > { %s1295_s19 = smov %s1290_s28 }
 0x132   :  { %612 = vsyncpa [#allocation3], 1 }
 0x133   :  { %614 = vsyncpa [#allocation3 + $0x1], 1 }
 0x134   :  { %615 = vsyncpa [#allocation6], 1 }
 0x135   :  { %617 = vsyncpa [#allocation6 + $0x1], 1 }
 0x136   :  { %618 = vsyncpa [#allocation4], 1 }
 0x137   :  { %620 = vsyncpa [#allocation4 + $0x1], 1 }

</bundles_post_ra>
